<compile_context>
chip_gen: v7x
topology: tpu7x:2x2x1
jax: 0.10.0
libtpu: 0.0.40
codegen_flags: <defaults>
</compile_context>

<pallas_src>
import functools

import jax
import jax.numpy as jnp
from jax import lax
from jax.experimental import pallas as pl
from jax.experimental.pallas import tpu as pltpu


def _round_up(x, m):
    return (x + m - 1) // m * m


# ---------------------------------------------------------------------------
# Kernels
# ---------------------------------------------------------------------------
def _mlp_kernel_resident(x_ref, w1_ref, b1_ref, w2_ref, b2_ref, o_ref):
    # x_ref: (bm, C_in)   w1_ref: (C_in, H_p)   b1_ref: (1, H_p)
    # w2_ref: (H_p, C_out_p)   b2_ref: (1, C_out_p)   o_ref: (bm, C_out_p)
    wdt = w1_ref.dtype
    h = jnp.dot(x_ref[...].astype(wdt), w1_ref[...],
                preferred_element_type=jnp.float32)
    h = h + b1_ref[...].astype(jnp.float32)
    # Exact (erf) GELU, matching torch.nn.GELU default.
    h = 0.5 * h * (1.0 + lax.erf(h * 0.7071067811865476))
    h = h.astype(wdt)
    out = jnp.dot(h, w2_ref[...], preferred_element_type=jnp.float32)
    out = out + b2_ref[...].astype(jnp.float32)
    o_ref[...] = out.astype(o_ref.dtype)


def _mlp_kernel_streamed(x_ref, w1_ref, b1_ref, w2_ref, b2_ref, o_ref, acc_ref):
    # x_ref: (bm, C_in)   w1_ref: (C_in, th)   b1_ref: (1, th)
    # w2_ref: (th, C_out_p)   b2_ref: (1, C_out_p)
    # o_ref: (bm, C_out_p)    acc_ref: (bm, C_out_p) f32 scratch
    h_idx = pl.program_id(1)

    @pl.when(h_idx == 0)
    def _init():
        acc_ref[...] = jnp.zeros_like(acc_ref)

    wdt = w1_ref.dtype
    h = jnp.dot(x_ref[...].astype(wdt), w1_ref[...],
                preferred_element_type=jnp.float32)
    h = h + b1_ref[...].astype(jnp.float32)
    h = 0.5 * h * (1.0 + lax.erf(h * 0.7071067811865476))
    acc_ref[...] += jnp.dot(h.astype(wdt), w2_ref[...],
                            preferred_element_type=jnp.float32)

    @pl.when(h_idx == pl.num_programs(1) - 1)
    def _finalize():
        o_ref[...] = (acc_ref[...] + b2_ref[...].astype(jnp.float32)).astype(o_ref.dtype)


# ---------------------------------------------------------------------------
# Wrapper
# ---------------------------------------------------------------------------
def _vmem_capacity_bytes():
    try:
        return int(pltpu.get_tpu_info().vmem_capacity_bytes)
    except Exception:
        return 64 << 20  # conservative (v7x per-TC)


@functools.partial(jax.jit,
                   static_argnames=("block_rows", "block_hidden", "force_streamed"))
def mlp_pallas(x, w1, b1, w2, b2, *, block_rows=512, block_hidden=512,
               force_streamed=False):
    """x: (..., C_in) -> (..., C_out). Weights stored as (in, out)."""
    orig_lead = x.shape[:-1]
    C_in = x.shape[-1]
    H = w1.shape[1]
    C_out = w2.shape[1]

    rows = 1
    for d in orig_lead:
        rows *= d
    x2d = x.reshape(rows, C_in)

    isz_x = jnp.dtype(x.dtype).itemsize
    isz_w = jnp.dtype(w1.dtype).itemsize
    sub = 16 if isz_x < 4 else 8

    # ---- Pad H and C_out to lane-dense multiples of 128 (numerically exact).
    H_p = _round_up(H, 128)
    C_out_p = _round_up(C_out, 128)
    w1p = jnp.pad(w1, ((0, 0), (0, H_p - H))) if H_p != H else w1
    b1p = jnp.pad(b1, (0, H_p - H)) if H_p != H else b1
    if H_p != H or C_out_p != C_out:
        w2p = jnp.pad(w2, ((0, H_p - H), (0, C_out_p - C_out)))
    else:
        w2p = w2
    b2p = jnp.pad(b2, (0, C_out_p - C_out)) if C_out_p != C_out else b2
    b1r = b1p.reshape(1, H_p)
    b2r = b2p.reshape(1, C_out_p)

    # ---- Row tile (sublane aligned, clamped for tiny inputs).
    bm = _round_up(min(block_rows, _round_up(rows, sub)), sub)
    # Give the "parallel" row axis >= 2 steps when possible (keeps both
    # TensorCores busy on v7x; negligible cost on single-TC chips).
    if pl.cdiv(rows, bm) < 2 and rows >= 2 * sub:
        bm = _round_up(pl.cdiv(rows, 2), sub)

    # ---- Generation-aware VMEM budget.
    cap = _vmem_capacity_bytes()
    cap_limit = max(32 << 20, (cap * 3) // 4)   # ~48 MiB v7x, ~96 MiB v5e/v6e
    budget = cap_limit - (2 << 20)              # slack for Mosaic internal scratch

    def resident_bytes(bm_):
        wts = 2 * (C_in * H_p + H_p + H_p * C_out_p + C_out_p) * isz_w  # 2 bufs/spec
        io = 2 * bm_ * C_in * isz_x + 2 * bm_ * C_out_p * isz_x
        inter = bm_ * H_p * 4 + bm_ * H_p * isz_w + bm_ * C_out_p * 4   # fc1 f32 + cast + fc2 f32
        return wts + io + inter

    def streamed_bytes(bm_, th_):
        wts = 2 * (C_in * th_ + th_ + th_ * C_out_p + C_out_p) * isz_w
        io = 2 * bm_ * C_in * isz_x + 2 * bm_ * C_out_p * isz_x
        inter = bm_ * th_ * 4 + bm_ * th_ * isz_w + bm_ * C_out_p * 4
        acc = bm_ * C_out_p * 4
        return wts + io + inter + acc

    # ---- Prefer fully VMEM-resident weights (fetched from HBM exactly once).
    resident_bm = None
    if not force_streamed:
        cand = bm
        while True:
            if resident_bytes(cand) <= budget:
                resident_bm = cand
                break
            if cand <= sub:
                break
            cand = max(sub, _round_up(cand // 2, sub))

    if resident_bm is not None:
        bm = resident_bm
        n_row = pl.cdiv(rows, bm)
        needed = resident_bytes(bm)
        vmem_limit = int(min(cap_limit, max(needed + (8 << 20), 32 << 20)))
        out2d = pl.pallas_call(
            _mlp_kernel_resident,
            out_shape=jax.ShapeDtypeStruct((rows, C_out_p), x.dtype),
            grid_spec=pltpu.PrefetchScalarGridSpec(
                num_scalar_prefetch=0,
                grid=(n_row,),
                in_specs=[
                    pl.BlockSpec((bm, C_in), lambda i: (i, 0)),
                    pl.BlockSpec((C_in, H_p), lambda i: (0, 0)),      # resident
                    pl.BlockSpec((1, H_p), lambda i: (0, 0)),         # resident
                    pl.BlockSpec((H_p, C_out_p), lambda i: (0, 0)),   # resident
                    pl.BlockSpec((1, C_out_p), lambda i: (0, 0)),     # resident
                ],
                out_specs=pl.BlockSpec((bm, C_out_p), lambda i: (i, 0)),
            ),
            compiler_params=pltpu.CompilerParams(
                dimension_semantics=("parallel",),
                vmem_limit_bytes=vmem_limit,
            ),
        )(x2d, w1p, b1r, w2p, b2r)
    else:
        # ---- Streamed fallback: tile the hidden dim, accumulate in f32 scratch.
        units = H_p // 128
        k = max(1, min(units, max(1, block_hidden // 128)))
        while units % k:
            k -= 1
        th = 128 * k
        bm_s = bm
        while streamed_bytes(bm_s, th) > budget and th > 128:
            k = th // 128 - 1
            while k >= 1 and units % k:
                k -= 1
            th = 128 * max(k, 1)
        while streamed_bytes(bm_s, th) > budget and bm_s > sub:
            bm_s = max(sub, _round_up(bm_s // 2, sub))
        bm = bm_s
        n_row = pl.cdiv(rows, bm)
        needed = streamed_bytes(bm, th)
        vmem_limit = int(min(cap_limit, max(needed + (8 << 20), 32 << 20)))
        out2d = pl.pallas_call(
            _mlp_kernel_streamed,
            out_shape=jax.ShapeDtypeStruct((rows, C_out_p), x.dtype),
            grid_spec=pltpu.PrefetchScalarGridSpec(
                num_scalar_prefetch=0,
                grid=(n_row, H_p // th),
                in_specs=[
                    pl.BlockSpec((bm, C_in), lambda i, h: (i, 0)),
                    pl.BlockSpec((C_in, th), lambda i, h: (0, h)),
                    pl.BlockSpec((1, th), lambda i, h: (0, h)),
                    pl.BlockSpec((th, C_out_p), lambda i, h: (h, 0)),
                    pl.BlockSpec((1, C_out_p), lambda i, h: (0, 0)),
                ],
                out_specs=pl.BlockSpec((bm, C_out_p), lambda i, h: (i, 0)),
                scratch_shapes=[pltpu.VMEM((bm, C_out_p), jnp.float32)],
            ),
            compiler_params=pltpu.CompilerParams(
                dimension_semantics=("parallel", "arbitrary"),
                vmem_limit_bytes=vmem_limit,
            ),
        )(x2d, w1p, b1r, w2p, b2r)

    if C_out_p != C_out:
        out2d = out2d[:, :C_out]
    return out2d.reshape(*orig_lead, C_out)


# ---------------------------------------------------------------------------
# Reference & tests
# ---------------------------------------------------------------------------
def _init_params(key, in_features, hidden_features, out_features, dtype=jnp.float32):
    """Deterministic init mimicking nn.Linear's uniform(-1/sqrt(fan_in), 1/sqrt(fan_in))."""
    k1, k2, k3, k4 = jax.random.split(key, 4)
    bound1 = 1.0 / jnp.sqrt(in_features)
    bound2 = 1.0 / jnp.sqrt(hidden_features)
    # Stored transposed relative to torch: (in, out) so the kernel does x @ W directly.
    w1 = jax.random.uniform(k1, (in_features, hidden_features), dtype, -bound1, bound1)
    b1 = jax.random.uniform(k2, (hidden_features,), dtype, -bound1, bound1)
    w2 = jax.random.uniform(k3, (hidden_features, out_features), dtype, -bound2, bound2)
    b2 = jax.random.uniform(k4, (out_features,), dtype, -bound2, bound2)
    return w1, b1, w2, b2


def _mlp_reference(x, w1, b1, w2, b2):
    h = jnp.dot(x, w1) + b1
    h = 0.5 * h * (1.0 + lax.erf(h / jnp.sqrt(2.0)))
    return jnp.dot(h, w2) + b2


if __name__ == "__main__":
    key = jax.random.PRNGKey(0)

    # Test 1: small transformer-encoder-like shapes (resident-weight path, 2 row blocks).
    B, N, C_in, H, C_out = 2, 8, 32, 64, 32
    kx, kp, key = jax.random.split(key, 3)
    x = jax.random.normal(kx, (B, N, C_in), jnp.float32)
    w1, b1, w2, b2 = _init_params(kp, C_in, H, C_out)
    out = jax.block_until_ready(mlp_pallas(x, w1, b1, w2, b2))
    ref = _mlp_reference(x, w1, b1, w2, b2)
    assert out.shape == (B, N, C_out)
    assert jnp.allclose(out, ref, atol=1e-5, rtol=1e-5), "mismatch vs reference (test 1)"

    # Test 2: ragged token count + non-128-multiple hidden + padded C_out (resident path).
    B, N, C_in, H, C_out = 2, 7, 32, 200, 48
    kx, kp, key = jax.random.split(key, 3)
    x = jax.random.normal(kx, (B, N, C_in), jnp.float32)
    w1, b1, w2, b2 = _init_params(kp, C_in, H, C_out)
    out = jax.block_until_ready(mlp_pallas(x, w1, b1, w2, b2))
    ref = _mlp_reference(x, w1, b1, w2, b2)
    assert out.shape == (B, N, C_out)
    assert jnp.allclose(out, ref, atol=1e-4, rtol=1e-4), "mismatch vs reference (test 2)"

    # Test 3: exercise the streamed (H-tiled, accumulating) fallback path.
    B, N, C_in, H, C_out = 2, 9, 32, 200, 48
    kx, kp = jax.random.split(key)
    x = jax.random.normal(kx, (B, N, C_in), jnp.float32)
    w1, b1, w2, b2 = _init_params(kp, C_in, H, C_out)
    out = jax.block_until_ready(
        mlp_pallas(x, w1, b1, w2, b2, block_hidden=128, force_streamed=True)
    )
    ref = _mlp_reference(x, w1, b1, w2, b2)
    assert out.shape == (B, N, C_out)
    assert jnp.allclose(out, ref, atol=1e-4, rtol=1e-4), "mismatch vs reference (test 3)"

    print("KERNEL_OK")
</pallas_src>

<mosaic_0001>
module attributes {stable_mosaic.version = 11 : i64} {
  func.func @_mlp_kernel_resident(%arg0: i32, %arg1: memref<8x32xf32, #tpu.memory_space<vmem>>, %arg2: memref<32x128xf32, #tpu.memory_space<vmem>>, %arg3: memref<1x128xf32, #tpu.memory_space<vmem>>, %arg4: memref<128x128xf32, #tpu.memory_space<vmem>>, %arg5: memref<1x128xf32, #tpu.memory_space<vmem>>, %arg6: memref<8x128xf32, #tpu.memory_space<vmem>>) attributes {dimension_semantics = [#tpu.dimension_semantics<parallel>], iteration_bounds = array<i64: 2>, scalar_prefetch = 0 : i64, scratch_operands = 0 : i64, tpu.core_type = #tpu.core_type<tc>, window_params = [{transform_indices = @transform_0, window_bounds = array<i64: 8, 32>}, {pipeline_mode = #tpu.pipeline_mode<synchronous>, transform_indices = @transform_1, window_bounds = array<i64: 32, 128>}, {pipeline_mode = #tpu.pipeline_mode<synchronous>, transform_indices = @transform_2, window_bounds = array<i64: 1, 128>}, {pipeline_mode = #tpu.pipeline_mode<synchronous>, transform_indices = @transform_3, window_bounds = array<i64: 128, 128>}, {pipeline_mode = #tpu.pipeline_mode<synchronous>, transform_indices = @transform_4, window_bounds = array<i64: 1, 128>}, {transform_indices = @transform_5, window_bounds = array<i64: 8, 128>}]} {
    %c0 = arith.constant 0 : index
    %c0_0 = arith.constant 0 : index
    %0 = vector.load %arg1[%c0, %c0_0] : memref<8x32xf32, #tpu.memory_space<vmem>>, vector<8x32xf32>
    %c0_1 = arith.constant 0 : index
    %c0_2 = arith.constant 0 : index
    %1 = vector.load %arg2[%c0_1, %c0_2] : memref<32x128xf32, #tpu.memory_space<vmem>>, vector<32x128xf32>
    %cst = arith.constant dense<0.000000e+00> : vector<8x128xf32>
    %2 = tpu.matmul %0, %1, %cst {dimension_numbers = #tpu.dot_dimension_numbers<[1], [0], [0], [1], [0, 0, 1, 1], [], []>} : vector<8x32xf32>, vector<32x128xf32>, vector<8x128xf32> -> vector<8x128xf32>
    %c0_3 = arith.constant 0 : index
    %c0_4 = arith.constant 0 : index
    %3 = vector.load %arg3[%c0_3, %c0_4] : memref<1x128xf32, #tpu.memory_space<vmem>>, vector<1x128xf32>
    %4 = vector.broadcast %3 : vector<1x128xf32> to vector<8x128xf32>
    %5 = arith.addf %2, %4 : vector<8x128xf32>
    %cst_5 = arith.constant 5.000000e-01 : f32
    %6 = vector.broadcast %cst_5 : f32 to vector<8x128xf32>
    %7 = arith.mulf %6, %5 : vector<8x128xf32>
    %cst_6 = arith.constant 0.707106769 : f32
    %8 = vector.broadcast %cst_6 : f32 to vector<8x128xf32>
    %9 = arith.mulf %5, %8 : vector<8x128xf32>
    %10 = math.erf %9 : vector<8x128xf32>
    %cst_7 = arith.constant 1.000000e+00 : f32
    %11 = vector.broadcast %cst_7 : f32 to vector<8x128xf32>
    %12 = arith.addf %11, %10 : vector<8x128xf32>
    %13 = arith.mulf %7, %12 : vector<8x128xf32>
    %c0_8 = arith.constant 0 : index
    %c0_9 = arith.constant 0 : index
    %14 = vector.load %arg4[%c0_8, %c0_9] : memref<128x128xf32, #tpu.memory_space<vmem>>, vector<128x128xf32>
    %cst_10 = arith.constant dense<0.000000e+00> : vector<8x128xf32>
    %15 = tpu.matmul %13, %14, %cst_10 {dimension_numbers = #tpu.dot_dimension_numbers<[1], [0], [0], [1], [0, 0, 1, 1], [], []>} : vector<8x128xf32>, vector<128x128xf32>, vector<8x128xf32> -> vector<8x128xf32>
    %c0_11 = arith.constant 0 : index
    %c0_12 = arith.constant 0 : index
    %16 = vector.load %arg5[%c0_11, %c0_12] : memref<1x128xf32, #tpu.memory_space<vmem>>, vector<1x128xf32>
    %17 = vector.broadcast %16 : vector<1x128xf32> to vector<8x128xf32>
    %18 = arith.addf %15, %17 : vector<8x128xf32>
    %c0_13 = arith.constant 0 : index
    %c0_14 = arith.constant 0 : index
    %19 = vector.load %arg6[%c0_13, %c0_14] : memref<8x128xf32, #tpu.memory_space<vmem>>, vector<8x128xf32>
    tpu.vector_store %arg6[%c0_13, %c0_14], %18 {strides = array<i32>} : memref<8x128xf32, #tpu.memory_space<vmem>>, vector<8x128xf32>,
    return
  }
  func.func @transform_0(%arg0: i32) -> (i32, i32) {
    %c0_i32 = arith.constant 0 : i32
    %c0_i32_0 = arith.constant 0 : i32
    return %arg0, %c0_i32 : i32, i32
  }
  func.func @transform_1(%arg0: i32) -> (i32, i32) {
    %c0_i32 = arith.constant 0 : i32
    %c0_i32_0 = arith.constant 0 : i32
    %c0_i32_1 = arith.constant 0 : i32
    return %c0_i32, %c0_i32_0 : i32, i32
  }
  func.func @transform_2(%arg0: i32) -> (i32, i32) {
    %c0_i32 = arith.constant 0 : i32
    %c0_i32_0 = arith.constant 0 : i32
    %c0_i32_1 = arith.constant 0 : i32
    return %c0_i32, %c0_i32_0 : i32, i32
  }
  func.func @transform_3(%arg0: i32) -> (i32, i32) {
    %c0_i32 = arith.constant 0 : i32
    %c0_i32_0 = arith.constant 0 : i32
    %c0_i32_1 = arith.constant 0 : i32
    return %c0_i32, %c0_i32_0 : i32, i32
  }
  func.func @transform_4(%arg0: i32) -> (i32, i32) {
    %c0_i32 = arith.constant 0 : i32
    %c0_i32_0 = arith.constant 0 : i32
    %c0_i32_1 = arith.constant 0 : i32
    return %c0_i32, %c0_i32_0 : i32, i32
  }
  func.func @transform_5(%arg0: i32) -> (i32, i32) {
    %c0_i32 = arith.constant 0 : i32
    %c0_i32_0 = arith.constant 0 : i32
    return %arg0, %c0_i32 : i32, i32
  }
}

</mosaic_0001>

<bundles_post_ra>
// kernel: mlp_pallas.1
= control target key start
LH: loop header
LB: loop body
LE: loop exit
PB: predicated region body
PF: predicated region fallthrough
CT: control target
= control target key end

     0   :  { %s622_s18 = smov 0   ;;  %s712_s0 = inlined_call_operand.vmem [shape: f32[16,32], index: 0, kind: input, shape index: {}]   ;;  %s713_s1 = inlined_call_operand.vmem [shape: f32[32,128], index: 1, kind: input, shape index: {}]   ;;  %s714_s2 = inlined_call_operand.vmem [shape: f32[1,128], index: 2, kind: input, shape index: {}]   ;;  %s715_s3 = inlined_call_operand.vmem [shape: f32[128,128], index: 3, kind: input, shape index: {}]   ;;  %s716_s4 = inlined_call_operand.vmem [shape: f32[1,128], index: 4, kind: input, shape index: {}]   ;;  %s717_s5 = inlined_call_operand.vmem [shape: f32[16,128], index: 5, kind: output, shape index: {}]  }
   0x1 LB: > { %s458_s19 = sadd.s32 4294967295, %s587_s18   ;;  %p462_p0 = scmp.ge.s32.totalorder %s587_s18, 1  ;;  %s587_s18 = sphi %s622_s18, %s15_s18  }
   0x2   : > { %p186_p1 = scmp.lt.s32.totalorder %s587_s18, 3 }
   0x4   : > { %p187_p2 = pnand %p462_p0, %p186_p1 }
   0x5   : > { %v221_v0 = vld [vmem:[%s713_s1] sm:$0xff] (!%p187_p2)  ;;  %v222_v1 = vld [vmem:[%s713_s1 + $0x8] sm:$0xff] (!%p187_p2)  ;;  %v223_v2 = vld [vmem:[%s713_s1 + $0x10] sm:$0xff] (!%p187_p2)  ;;  %v589_v3 = vmov (!%p187_p2), 0.0|0.0   ;;  %vm590_vm0 = vmmov (!%p187_p2), 0   ;;  %v591_v6 = vmov (!%p187_p2), 0.0  }
   0x6   : > { %190 = sbr.rel (%p187_p2) target bundleno = 463 (0x1cf), region = 40  ;;  %538 = vmatprep.subr.bf16.mxu0 (!%p187_p2), %v589_v3  ;;  %v539_v4 = vpack.c.bf16 (!%p187_p2), %v222_v1, %v221_v0  ;;  %v224_v5 = vld [vmem:[%s713_s1 + $0x18] sm:$0xff] (!%p187_p2)  ;;  %500 = vmatprep.mubr.msk.f32.mxu0 (!%p187_p2), %vm590_vm0, %v591_v6  ;;  %p212_p3 = scmp.lt.s32.totalorder (!%p187_p2), %s458_s19, 1  ;;  %v311_v7 = vld [vmem:[%s715_s3] sm:$0xff] (!%p187_p2)  ;;  %v312_v8 = vld [vmem:[%s715_s3 + $0x8] sm:$0xff] (!%p187_p2)  ;;  %vm232_vm1 = vcmask (!%p187_p2), 261120  }
   0x7   : > { %544 = vmatprep.subr.bf16.mxu1 (!%p187_p2), %v589_v3  ;;  %v545_v9 = vpack.c.bf16 (!%p187_p2), %v312_v8, %v311_v7  ;;  %v313_v10 = vld [vmem:[%s715_s3 + $0x10] sm:$0xff] (!%p187_p2)  ;;  %v314_v11 = vld [vmem:[%s715_s3 + $0x18] sm:$0xff] (!%p187_p2)  ;;  %535 = vmatprep.mubr.msk.f32.mxu1 (!%p187_p2), %vm590_vm0, %v591_v6  ;;  %v542_v12 = vpack.c.bf16 (!%p187_p2), %v224_v5, %v223_v2  ;;  %v315_v14 = vld [vmem:[%s715_s3 + $0x20] sm:$0xff] (!%p187_p2) }
   0x8   : > { %540 = vmatpush3.bf16.msra.mxu0 (!%p187_p2), %v539_v4  ;;  %v548_v13 = vpack.c.bf16 (!%p187_p2), %v314_v11, %v313_v10  ;;  %v316_v15 = vld [vmem:[%s715_s3 + $0x28] sm:$0xff] (!%p187_p2)  ;;  %v317_v18 = vld [vmem:[%s715_s3 + $0x30] sm:$0xff] (!%p187_p2)  ;;  %v318_v19 = vld [vmem:[%s715_s3 + $0x38] sm:$0xff] (!%p187_p2) }
   0x9   : > { %541 = vmatprep.subr.bf16.mxu0 (!%p187_p2), %v589_v3  ;;  %546 = vmatpush3.bf16.msra.mxu1 (!%p187_p2), %v545_v9  ;;  %v551_v17 = vpack.c.bf16 (!%p187_p2), %v316_v15, %v315_v14  ;;  %v554_v20 = vpack.c.bf16 (!%p187_p2), %v318_v19, %v317_v18  ;;  %v319_v21 = vld [vmem:[%s715_s3 + $0x40] sm:$0xff] (!%p187_p2)  ;;  %v320_v22 = vld [vmem:[%s715_s3 + $0x48] sm:$0xff] (!%p187_p2)  ;;  %v321_v24 = vld [vmem:[%s715_s3 + $0x50] sm:$0xff] (!%p187_p2) }
   0xa   : > { %547 = vmatprep.subr.bf16.mxu1 (!%p187_p2), %v589_v3  ;;  %v557_v23 = vpack.c.bf16 (!%p187_p2), %v320_v22, %v319_v21  ;;  %v322_v25 = vld [vmem:[%s715_s3 + $0x58] sm:$0xff] (!%p187_p2)  ;;  %v323_v27 = vld [vmem:[%s715_s3 + $0x60] sm:$0xff] (!%p187_p2)  ;;  %v324_v28 = vld [vmem:[%s715_s3 + $0x68] sm:$0xff] (!%p187_p2) }
   0xb   : > { %v560_v26 = vpack.c.bf16 (!%p187_p2), %v322_v25, %v321_v24  ;;  %v563_v29 = vpack.c.bf16 (!%p187_p2), %v324_v28, %v323_v27  ;;  %v325_v30 = vld [vmem:[%s715_s3 + $0x70] sm:$0xff] (!%p187_p2)  ;;  %v326_v31 = vld [vmem:[%s715_s3 + $0x78] sm:$0xff] (!%p187_p2)  ;;  %v465_v33 = vld [vmem:[%s714_s2] ss:$0 sm:$0xff] (!%p187_p2) }
   0xc   : > { %543 = vmatpush3.bf16.msra.mxu0 (!%p187_p2), %v542_v12  ;;  %v566_v32 = vpack.c.bf16 (!%p187_p2), %v326_v31, %v325_v30  ;;  %v467_v42 = vld [vmem:[%s716_s4] ss:$0 sm:$0xff] (!%p187_p2) }
   0xd   : > { %s719_s19 = smov (!%p212_p3, %s458_s19), 1  ;;  %549 = vmatpush3.bf16.msra.mxu1 %v548_v13 }
   0xe   : > { %s463_s11 = sshll.u32 %s719_s19, 3  ;;  %550 = vmatprep.subr.bf16.mxu1 %v589_v3 }
   0xf   : > { %s215_s20 = scalar_lea.vmem %s712_s0, %s463_s11  ;;  %s219_s25 = scalar_lea.vmem %s717_s5, %s463_s11 }
  0x10   : > { %v220_v16 = vld [vmem:[%s215_s20] sm:$0xff] }
  0x11   : > { %501 = vmatmul.mubr.msk.f32.vlgmr.msra.gmra.mrb[0].mxu0 %vm232_vm1, %v220_v16  ;;  %552 = vmatpush3.bf16.msra.mxu1 %v551_v17 }
  0x12   : > { %553 = vmatprep.subr.bf16.mxu1 %v589_v3 }
  0x15   : > { %555 = vmatpush3.bf16.msra.mxu1 %v554_v20 }
  0x16   : > { %556 = vmatprep.subr.bf16.mxu1 %v589_v3 }
  0x19   : > { %558 = vmatpush3.bf16.msra.mxu1 %v557_v23 }
  0x1a   : > { %559 = vmatprep.subr.bf16.mxu1 %v589_v3 }
  0x1d   : > { %561 = vmatpush3.bf16.msra.mxu1 %v560_v26 }
  0x1e   : > { %562 = vmatprep.subr.bf16.mxu1 %v589_v3 }
  0x21   : > { %564 = vmatpush3.bf16.msra.mxu1 %v563_v29 }
  0x22   : > { %565 = vmatprep.subr.bf16.mxu1 %v589_v3 }
  0x25   : > { %567 = vmatpush3.bf16.msra.mxu1 %v566_v32 }
  0xe4   : > { %v302_v34 = vpop.f32.mrb[0].mxu0 }
  0xe5   : > { %v303_v35 = vadd.f32 %v465_v33, %v302_v34  ;;  %v502_v36 = vpop.f32.mrb[1].mxu0 }
  0xe7   : > { %v307_v37 = vmul.f32 0.70710677, %v303_v35  ;;  %v306_v39 = vmul.f32 0.5, %v303_v35 }
  0xe9   : > { %579 = verf.f32 %v307_v37 }
  0xf3   : > { %v580_v38 = vpop.eup %579 }
  0xf4   : > { %v309_v40 = vadd.f32 1.0, %v580_v38 }
  0xf6   : > { %v310_v41 = vmul.f32 %v309_v40, %v306_v39 }
  0xf8   : > { %536 = vmatmul.mubr.f32.vlgmr.msra.gmra.mrb[0].mxu1 %v310_v41 }
 0x1cb   : > { %v400_v43 = vpop.f32.mrb[0].mxu1 }
 0x1cc   : > { %v401_v44 = vadd.f32 %v467_v42, %v400_v43  ;;  %v537_v45 = vpop.f32.mrb[1].mxu1 }
 0x1ce   : > { %404 = vst [vmem:[%s219_s25] sm:$0xff] %v401_v44 }
 0x1cf PF: > { %s15_s18 = sadd.s32 1, %s587_s18  }
 0x1d0   : > { %p12_p4 = scmp.ge.s32.totalorder %s15_s18, 4  }
 0x1d2   :  { %14 = sbr.rel (!%p12_p4) target bundleno = 1 (0x1), region = 70 }

</bundles_post_ra>
